<compile_context>
chip_gen: v5e
topology: v5e:2x2
jax: 0.10.0
libtpu: 0.0.40
codegen_flags: <defaults>
</compile_context>

<pallas_src>
import functools

import jax
import jax.numpy as jnp
from jax.experimental import pallas as pl
from jax.experimental.pallas import tpu as pltpu


# ---------- kernel 1: fused  h = x @ W,  s = h·a_left,  t = h·a_right ----------
def _linear_proj_kernel(x_ref, w_ref, a1_ref, a2_ref, h_ref, s_ref, t_ref):
    h = jnp.dot(x_ref[...], w_ref[...],
                preferred_element_type=jnp.float32)              # [TM, F]
    h_ref[...] = h
    # VPU multiply + lane reduction instead of [TM,F]x[F,1] MXU matvecs.
    s_ref[...] = jnp.sum(h * a1_ref[...], axis=-1, keepdims=True)  # [TM, 1]
    t_ref[...] = jnp.sum(h * a2_ref[...], axis=-1, keepdims=True)  # [TM, 1]


def linear_and_proj(x, w, a1_row, a2_row, *, tm):
    n, f_in = x.shape
    f_out = w.shape[1]
    return pl.pallas_call(
        _linear_proj_kernel,
        out_shape=(
            jax.ShapeDtypeStruct((n, f_out), jnp.float32),   # h
            jax.ShapeDtypeStruct((n, 1), jnp.float32),       # s = h·a_left
            jax.ShapeDtypeStruct((n, 1), jnp.float32),       # t = h·a_right
        ),
        grid=(n // tm,),
        in_specs=[
            pl.BlockSpec((tm, f_in), lambda i: (i, 0)),
            pl.BlockSpec((f_in, f_out), lambda i: (0, 0)),
            pl.BlockSpec((1, f_out), lambda i: (0, 0)),
            pl.BlockSpec((1, f_out), lambda i: (0, 0)),
        ],
        out_specs=(
            pl.BlockSpec((tm, f_out), lambda i: (i, 0)),
            pl.BlockSpec((tm, 1), lambda i: (i, 0)),
            pl.BlockSpec((tm, 1), lambda i: (i, 0)),
        ),
        compiler_params=pltpu.CompilerParams(
            dimension_semantics=("parallel",)),
    )(x, w, a1_row, a2_row)


# ------------- kernel 2: masked attention + aggregation (tiled over N) ---------
def _gat_attn_kernel(s_ref, t_ref, adj_ref, h_ref, out_ref,
                     acc_ref, rowsum_ref, *, alpha, concat):
    k = pl.program_id(1)

    @pl.when(k == 0)
    def _():
        acc_ref[...] = jnp.zeros_like(acc_ref)
        rowsum_ref[...] = jnp.zeros_like(rowsum_ref)

    # attention logits for this (row tile, neighbor tile): s_i + t_j
    logits = s_ref[...] + t_ref[...]                       # [TM,1]+[1,TN] -> [TM,TN]
    lrelu = jnp.where(logits > 0, logits, alpha * logits)
    e = jnp.where(adj_ref[...] != 0, jnp.exp(-lrelu), 0.0)  # [TM, TN] f32

    rowsum_ref[...] += jnp.sum(e, axis=-1, keepdims=True)
    acc_ref[...] += jnp.dot(e, h_ref[...],
                            preferred_element_type=jnp.float32)

    @pl.when(k == pl.num_programs(1) - 1)
    def _():
        # Guard degree-0 nodes (torch would assert on the resulting NaN).
        inv = pl.reciprocal(jnp.maximum(rowsum_ref[...], 1e-30), approx=True)
        hp = acc_ref[...] * inv
        if concat:
            hp = jnp.where(hp > 0, hp, jnp.expm1(hp))      # ELU
        out_ref[...] = hp.astype(out_ref.dtype)


def sp_graph_attention_layer(x, adj, W, a, *, alpha=0.2, concat=True,
                             tm=128, tn=128):
    """Forward pass of SpGraphAttentionLayer (eval-mode dropout)."""
    n = x.shape[0]
    f_out = W.shape[1]
    assert n % tm == 0 and n % tn == 0
    assert tm % 32 == 0 and tn % 128 == 0      # int8 adj tile constraints

    a1_row = a[:, :f_out].astype(jnp.float32)   # (1, F)  a_left
    a2_row = a[:, f_out:].astype(jnp.float32)   # (1, F)  a_right

    # Tiled/pipelined linear pass, fused with both attention projections.
    h, s, t = linear_and_proj(x.astype(jnp.float32), W.astype(jnp.float32),
                              a1_row, a2_row, tm=tm)
    t_row = t.reshape(1, n)                     # lane-dense [1, N]

    # Edge mask as int8 (only the nonzero pattern of adj matters).
    adj_mask = adj if adj.dtype == jnp.int8 else (adj != 0).astype(jnp.int8)

    kernel = functools.partial(_gat_attn_kernel, alpha=alpha, concat=concat)
    return pl.pallas_call(
        kernel,
        out_shape=jax.ShapeDtypeStruct((n, f_out), jnp.float32),
        grid=(n // tm, n // tn),
        in_specs=[
            pl.BlockSpec((tm, 1), lambda i, k: (i, 0)),     # s rows of tile
            pl.BlockSpec((1, tn), lambda i, k: (0, k)),     # t neighbor slice
            pl.BlockSpec((tm, tn), lambda i, k: (i, k)),    # adj tile (int8)
            pl.BlockSpec((tn, f_out), lambda i, k: (k, 0)), # h neighbor rows
        ],
        out_specs=pl.BlockSpec((tm, f_out), lambda i, k: (i, 0)),
        scratch_shapes=[
            pltpu.VMEM((tm, f_out), jnp.float32),           # e @ h accumulator
            pltpu.VMEM((tm, 1), jnp.float32),               # rowsum accumulator
        ],
        compiler_params=pltpu.CompilerParams(
            dimension_semantics=("parallel", "arbitrary"),
            vmem_limit_bytes=32 * 1024 * 1024),
    )(s, t_row, adj_mask, h)


# --------------------------------- reference -----------------------------------
def reference(x, adj, W, a, *, alpha=0.2, concat=True):
    f_out = W.shape[1]
    h = x @ W
    a1 = a[0, :f_out]
    a2 = a[0, f_out:]
    logits = (h @ a1[:, None]) + (h @ a2[:, None]).T
    lrelu = jnp.where(logits > 0, logits, alpha * logits)
    e = jnp.exp(-lrelu) * (adj != 0).astype(jnp.float32)
    rowsum = e.sum(-1, keepdims=True)
    hp = (e @ h) / rowsum
    if concat:
        hp = jnp.where(hp > 0, hp, jnp.expm1(hp))
    return hp


# ----------------------------------- main ---------------------------------------
if __name__ == "__main__":
    N, F_IN, F_OUT = 256, 16, 128   # F_OUT=128 keeps the output slab lane-dense
    ALPHA = 0.2                     # LeakyReLU negative slope (the layer's `alpha`)
    CONCAT = True
    TM, TN = 128, 128

    key = jax.random.PRNGKey(0)
    kx, kadj, kw, ka = jax.random.split(key, 4)

    x = jax.random.normal(kx, (N, F_IN), dtype=jnp.float32)

    # deterministic sparse-ish adjacency (int8 mask) with self-loops
    adj = (jax.random.uniform(kadj, (N, N)) < 0.25).astype(jnp.int8)
    adj = jnp.maximum(adj, jnp.eye(N, dtype=jnp.int8))

    # xavier_normal_ with gain=1.414 (deterministic, in-script init)
    gain = 1.414
    std_w = gain * (2.0 / (F_IN + F_OUT)) ** 0.5
    W = std_w * jax.random.normal(kw, (F_IN, F_OUT), dtype=jnp.float32)
    std_a = gain * (2.0 / (1 + 2 * F_OUT)) ** 0.5
    a = std_a * jax.random.normal(ka, (1, 2 * F_OUT), dtype=jnp.float32)

    out = sp_graph_attention_layer(x, adj, W, a, alpha=ALPHA, concat=CONCAT,
                                   tm=TM, tn=TN)
    out = jax.block_until_ready(out)

    ref = reference(x, adj, W, a, alpha=ALPHA, concat=CONCAT)
    assert out.shape == (N, F_OUT)
    # tolerance covers pl.reciprocal(approx=True) in the normalization
    assert jnp.allclose(out, ref, atol=5e-3, rtol=5e-3), "mismatch vs reference"

    print("KERNEL_OK")
</pallas_src>

<mosaic_0001>
module attributes {stable_mosaic.version = 11 : i64} {
  func.func @_linear_proj_kernel(%arg0: i32, %arg1: memref<128x16xf32, #tpu.memory_space<vmem>>, %arg2: memref<16x128xf32, #tpu.memory_space<vmem>>, %arg3: memref<1x128xf32, #tpu.memory_space<vmem>>, %arg4: memref<1x128xf32, #tpu.memory_space<vmem>>, %arg5: memref<128x128xf32, #tpu.memory_space<vmem>>, %arg6: memref<128x1xf32, #tpu.memory_space<vmem>>, %arg7: memref<128x1xf32, #tpu.memory_space<vmem>>) attributes {dimension_semantics = [#tpu.dimension_semantics<parallel>], iteration_bounds = array<i64: 2>, scalar_prefetch = 0 : i64, scratch_operands = 0 : i64, tpu.core_type = #tpu.core_type<tc>, window_params = [{transform_indices = @transform_0, window_bounds = array<i64: 128, 16>}, {pipeline_mode = #tpu.pipeline_mode<synchronous>, transform_indices = @transform_1, window_bounds = array<i64: 16, 128>}, {pipeline_mode = #tpu.pipeline_mode<synchronous>, transform_indices = @transform_2, window_bounds = array<i64: 1, 128>}, {pipeline_mode = #tpu.pipeline_mode<synchronous>, transform_indices = @transform_3, window_bounds = array<i64: 1, 128>}, {transform_indices = @transform_4, window_bounds = array<i64: 128, 128>}, {transform_indices = @transform_5, window_bounds = array<i64: 128, 1>}, {transform_indices = @transform_6, window_bounds = array<i64: 128, 1>}]} {
    %c0 = arith.constant 0 : index
    %c0_0 = arith.constant 0 : index
    %0 = vector.load %arg1[%c0, %c0_0] : memref<128x16xf32, #tpu.memory_space<vmem>>, vector<128x16xf32>
    %c0_1 = arith.constant 0 : index
    %c0_2 = arith.constant 0 : index
    %1 = vector.load %arg2[%c0_1, %c0_2] : memref<16x128xf32, #tpu.memory_space<vmem>>, vector<16x128xf32>
    %cst = arith.constant dense<0.000000e+00> : vector<128x128xf32>
    %2 = tpu.matmul %0, %1, %cst {dimension_numbers = #tpu.dot_dimension_numbers<[1], [0], [0], [1], [0, 0, 1, 1], [], []>} : vector<128x16xf32>, vector<16x128xf32>, vector<128x128xf32> -> vector<128x128xf32>
    %c0_3 = arith.constant 0 : index
    %c0_4 = arith.constant 0 : index
    %3 = vector.load %arg5[%c0_3, %c0_4] : memref<128x128xf32, #tpu.memory_space<vmem>>, vector<128x128xf32>
    tpu.vector_store %arg5[%c0_3, %c0_4], %2 {strides = array<i32>} : memref<128x128xf32, #tpu.memory_space<vmem>>, vector<128x128xf32>,
    %c0_5 = arith.constant 0 : index
    %c0_6 = arith.constant 0 : index
    %4 = vector.load %arg3[%c0_5, %c0_6] : memref<1x128xf32, #tpu.memory_space<vmem>>, vector<1x128xf32>
    %5 = vector.broadcast %4 : vector<1x128xf32> to vector<128x128xf32>
    %6 = arith.mulf %2, %5 : vector<128x128xf32>
    %cst_7 = arith.constant dense<0.000000e+00> : vector<128xf32>
    %7 = vector.multi_reduction <add>, %6, %cst_7 [1] : vector<128x128xf32> to vector<128xf32>
    %8 = vector.shape_cast %7 : vector<128xf32> to vector<128x1xf32>
    %c0_8 = arith.constant 0 : index
    %c0_9 = arith.constant 0 : index
    %9 = vector.load %arg6[%c0_8, %c0_9] : memref<128x1xf32, #tpu.memory_space<vmem>>, vector<128x1xf32>
    tpu.vector_store %arg6[%c0_8, %c0_9], %8 {strides = array<i32>} : memref<128x1xf32, #tpu.memory_space<vmem>>, vector<128x1xf32>,
    %c0_10 = arith.constant 0 : index
    %c0_11 = arith.constant 0 : index
    %10 = vector.load %arg4[%c0_10, %c0_11] : memref<1x128xf32, #tpu.memory_space<vmem>>, vector<1x128xf32>
    %11 = vector.broadcast %10 : vector<1x128xf32> to vector<128x128xf32>
    %12 = arith.mulf %2, %11 : vector<128x128xf32>
    %cst_12 = arith.constant dense<0.000000e+00> : vector<128xf32>
    %13 = vector.multi_reduction <add>, %12, %cst_12 [1] : vector<128x128xf32> to vector<128xf32>
    %14 = vector.shape_cast %13 : vector<128xf32> to vector<128x1xf32>
    %c0_13 = arith.constant 0 : index
    %c0_14 = arith.constant 0 : index
    %15 = vector.load %arg7[%c0_13, %c0_14] : memref<128x1xf32, #tpu.memory_space<vmem>>, vector<128x1xf32>
    tpu.vector_store %arg7[%c0_13, %c0_14], %14 {strides = array<i32>} : memref<128x1xf32, #tpu.memory_space<vmem>>, vector<128x1xf32>,
    return
  }
  func.func @transform_0(%arg0: i32) -> (i32, i32) {
    %c0_i32 = arith.constant 0 : i32
    %c0_i32_0 = arith.constant 0 : i32
    return %arg0, %c0_i32 : i32, i32
  }
  func.func @transform_1(%arg0: i32) -> (i32, i32) {
    %c0_i32 = arith.constant 0 : i32
    %c0_i32_0 = arith.constant 0 : i32
    %c0_i32_1 = arith.constant 0 : i32
    return %c0_i32, %c0_i32_0 : i32, i32
  }
  func.func @transform_2(%arg0: i32) -> (i32, i32) {
    %c0_i32 = arith.constant 0 : i32
    %c0_i32_0 = arith.constant 0 : i32
    %c0_i32_1 = arith.constant 0 : i32
    return %c0_i32, %c0_i32_0 : i32, i32
  }
  func.func @transform_3(%arg0: i32) -> (i32, i32) {
    %c0_i32 = arith.constant 0 : i32
    %c0_i32_0 = arith.constant 0 : i32
    %c0_i32_1 = arith.constant 0 : i32
    return %c0_i32, %c0_i32_0 : i32, i32
  }
  func.func @transform_4(%arg0: i32) -> (i32, i32) {
    %c0_i32 = arith.constant 0 : i32
    %c0_i32_0 = arith.constant 0 : i32
    return %arg0, %c0_i32 : i32, i32
  }
  func.func @transform_5(%arg0: i32) -> (i32, i32) {
    %c0_i32 = arith.constant 0 : i32
    %c0_i32_0 = arith.constant 0 : i32
    return %arg0, %c0_i32 : i32, i32
  }
  func.func @transform_6(%arg0: i32) -> (i32, i32) {
    %c0_i32 = arith.constant 0 : i32
    %c0_i32_0 = arith.constant 0 : i32
    return %arg0, %c0_i32 : i32, i32
  }
}

</mosaic_0001>

<bundles_post_ra>
// kernel: tpu_custom_call.1
= control target key start
LH: loop header
LB: loop body
LE: loop exit
PB: predicated region body
PF: predicated region fallthrough
CT: control target
= control target key end

     0   :  { %12 = vsyncpa [#allocation3], 0  ;;  %s1154_s0 = inlined_call_operand.vmem [shape: f32[256,16], index: 0, kind: input, shape index: {}]   ;;  %s1155_s1 = inlined_call_operand.vmem [shape: f32[16,128], index: 1, kind: input, shape index: {}]   ;;  %s1156_s2 = inlined_call_operand.vmem [shape: f32[1,128], index: 2, kind: input, shape index: {}]   ;;  %s1157_s3 = inlined_call_operand.vmem [shape: f32[1,128], index: 3, kind: input, shape index: {}]   ;;  %s1158_s4 = inlined_call_operand.hbm [shape: f32[256,128], index: 4, kind: output, shape index: {0}]   ;;  %s1159_s5 = inlined_call_operand.vmem [shape: f32[256,1], index: 5, kind: output, shape index: {1}]   ;;  %s1160_s6 = inlined_call_operand.vmem [shape: f32[256,1], index: 6, kind: output, shape index: {2}]  }
   0x1   :  { %14 = vsyncpa [#allocation3 + $0x1], 0  ;;  %s894_s21 = smov 0   ;;  %s896_s22 = smov 0  }
   0x2   :  { %s898_s23 = smov 0   ;;  %s900_s24 = smov 0  }
   0x3 LB: > { %s915_s25 = sadd.s32 4294967295, %s855_s24   ;;  %s711_s26 = sadd.s32 4294967294, %s855_s24   ;;  %s855_s24 = sphi %s900_s24, %s1166_s24   ;;  %s851_s23 = sphi %s898_s23, %s1165_s23   ;;  %s847_s22 = sphi %s896_s22, %s1164_s22   ;;  %s843_s21 = sphi %s894_s21, %s1163_s21  }
   0x4   : > { %s919_s27 = sadd.s32 1, %s855_s24   ;;  %s116_s28 = sadd.s32 1, %s851_s23 }
   0x5   : > { %s113_s29 = ssub.s32 %s855_s24, %s919_s27  ;;  %p126_p0 = scmp.ne.s32.totalorder %s851_s23, %s847_s22 }
   0x6   : > { %p114_p1 = scmp.eq.s32.totalorder %s113_s29, 0  ;;  %p127_p2 = scmp.eq.s32.totalorder %s915_s25, 1 }
   0x7   : > { %p132_p3 = scmp.ne.s32.totalorder %s847_s22, %s843_s21  ;;  %p133_p4 = scmp.eq.s32.totalorder %s711_s26, 1 }
   0x8   : > { %s930_s30 = scalar_select %p114_p1, %s851_s23, %s116_s28  }
   0x9   : > { %p932_p5 = por %p127_p2, %p126_p0  ;;  %p936_p6 = por %p133_p4, %p132_p3 }
   0xa   : > { %p714_p7 = scmp.ge.s32.totalorder %s855_s24, 1  ;;  %p221_p8 = scmp.lt.s32.totalorder %s855_s24, 3 }
   0xc   : > { %p222_p9 = pnand %p714_p7, %p221_p8 }
   0xd   : > { %s716_s13 = sshll.u32 (!%p222_p9), %s915_s25, 4  ;;  %s244_s18 = sand.u32 (!%p222_p9), 1, %s847_s22  }
   0xe   : > { %225 = sbr.rel (%p222_p9) target bundleno = 350 (0x15e), region = 36  ;;  %p262_p10 = scmp.lt.s32.totalorder (!%p222_p9), %s716_s13, 31 }
   0xf   : > { %s715_s19 = sshll.u32 (!%p222_p9), %s244_s18, 7  ;;  %s743_s10 = sshll.u32 (!%p222_p9), %s915_s25, 7 }
  0x10   : > { %s984_s9 = scalar_lea.vmem (!%p222_p9), [#allocation2], %s715_s19  ;;  %s813_s28 = scalar_lea.hbm (!%p222_p9), %s1158_s4, 256 }
  0x11   : > { %s588_s15 = sshll.u32 (!%p222_p9), %s984_s9, 4  ;;  %s589_s15 = int_to_ptr.vmem [resolvable:$true] %s588_s15 }
  0x13   : > { %v297_v0 = vld [vmem:[%s1155_s1 + $0x8] sm:$0xff]  ;;  %v296_v1 = vld [vmem:[%s1155_s1] sm:$0xff]  ;;  %s1168_s13 = smov (!%p262_p10, %s716_s13), 31  ;;  %vm298_vm0 = vcmask 130048  }
  0x14   : > { %361 = vmatpush.msra.mxu0 %v297_v0  ;;  %744 = vmatpush.msra.mxu1 %v297_v0  ;;  %s949_s14 = sshll.u32 %s1168_s13, 3  ;;  %v977_v18 = vld [vmem:[%s1156_s2] ss:$0 sm:$0xff]  ;;  %s587_s13 = scalar_lea.hbm %s1158_s4, %s743_s10 }
  0x15   : > { %746 = vmatpush.msra.mxu3 %v297_v0  ;;  %745 = vmatpush.msra.mxu2 %v297_v0  ;;  %s265_s17 = scalar_lea.vmem %s1154_s0, %s949_s14  ;;  %v982_v19 = vld [vmem:[%s1157_s3] ss:$0 sm:$0xff]  ;;  %s590_s16 = sshll.u32 %s587_s13, 4  ;;  %s591_s16 = int_to_ptr.hbm [resolvable:$true] %s590_s16 }
  0x16   : > { %362 = vmatpush.msra.mxu0 %v296_v1  ;;  %747 = vmatpush.msra.mxu1 %v296_v1  ;;  %v280_v2 = vld [vmem:[%s265_s17] sm:$0xff]  ;;  %v281_v6 = vld [vmem:[%s265_s17 + $0x8] sm:$0xff]  ;;  %v282_v10 = vld [vmem:[%s265_s17 + $0x10] sm:$0xff]  ;;  %s807_s19 = sshra.s32 %s591_s16, 4  ;;  %s808_s19 = int_to_ptr.hbm [resolvable:$true] %s807_s19 }
  0x17   : > { %749 = vmatpush.msra.mxu3 %v296_v1  ;;  %748 = vmatpush.msra.mxu2 %v296_v1  ;;  %v284_v3 = vld [vmem:[%s265_s17 + $0x20] sm:$0xff]  ;;  %v285_v7 = vld [vmem:[%s265_s17 + $0x28] sm:$0xff]  ;;  %v286_v11 = vld [vmem:[%s265_s17 + $0x30] sm:$0xff]  ;;  %s809_s25 = scalar_lea.hbm %s808_s19, 128  ;;  %p814_p0 = scmp.lt.s32.totalorder %s808_s19, %s1158_s4 }
  0x18   : > { %v292_v4 = vld [vmem:[%s265_s17 + $0x60] sm:$0xff]  ;;  %722 = vmatmul.msk.f32.vlgmr.msra.gmra.mxu0 %vm298_vm0, %v280_v2  ;;  %726 = vmatmul.msk.f32.vlgmr.msra.gmra.mxu1 %vm298_vm0, %v284_v3  ;;  %v293_v8 = vld [vmem:[%s265_s17 + $0x68] sm:$0xff]  ;;  %v294_v12 = vld [vmem:[%s265_s17 + $0x70] sm:$0xff]  ;;  %p810_p11 = scmp.ne.s32.totalorder %s808_s19, %s809_s25  ;;  %p815_p1 = scmp.lt.s32.totalorder %s813_s28, %s809_s25 }
  0x19   : > { %v288_v5 = vld [vmem:[%s265_s17 + $0x40] sm:$0xff]  ;;  %734 = vmatmul.msk.f32.vlgmr.msra.gmra.mxu3 %vm298_vm0, %v292_v4  ;;  %v289_v9 = vld [vmem:[%s265_s17 + $0x48] sm:$0xff]  ;;  %v290_v13 = vld [vmem:[%s265_s17 + $0x50] sm:$0xff] }
  0x1a   : > { %730 = vmatmul.msk.f32.vlgmr.msra.gmra.mxu2 %vm298_vm0, %v288_v5  ;;  %v283_v14 = vld [vmem:[%s265_s17 + $0x18] sm:$0xff]  ;;  %p811_p12 = pnand %p810_p11, %p932_p5  ;;  %p816_p2 = por %p815_p1, %p814_p0 }
  0x1b   : > { %v287_v15 = vld [vmem:[%s265_s17 + $0x38] sm:$0xff] }
  0x1c   : > { %v291_v16 = vld [vmem:[%s265_s17 + $0x58] sm:$0xff]  ;;  %p812_p13 = pneg %p811_p12 }
  0x1d   : > { %v295_v17 = vld [vmem:[%s265_s17 + $0x78] sm:$0xff]  ;;  %s566_s17 = scalar_lea.sflag [#allocation3], %s244_s18 }
  0x1e   : > { %p817_p3 = pnand %p816_p2, %p812_p13 }
  0x20   : > { %723 = vmatmul.msk.f32.gmra.mxu0 %vm298_vm0, %v281_v6  ;;  %727 = vmatmul.msk.f32.gmra.mxu1 %vm298_vm0, %v285_v7 }
  0x21   : > { %735 = vmatmul.msk.f32.gmra.mxu3 %vm298_vm0, %v293_v8 }
  0x22   : > { %731 = vmatmul.msk.f32.gmra.mxu2 %vm298_vm0, %v289_v9 }
  0x28   : > { %724 = vmatmul.msk.f32.gmra.mxu0 %vm298_vm0, %v282_v10  ;;  %728 = vmatmul.msk.f32.gmra.mxu1 %vm298_vm0, %v286_v11 }
  0x29   : > { %736 = vmatmul.msk.f32.gmra.mxu3 %vm298_vm0, %v294_v12 }
  0x2a   : > { %732 = vmatmul.msk.f32.gmra.mxu2 %vm298_vm0, %v290_v13 }
  0x30   : > { %725 = vmatmul.msk.f32.gmra.mxu0 %vm298_vm0, %v283_v14  ;;  %729 = vmatmul.msk.f32.gmra.mxu1 %vm298_vm0, %v287_v15 }
  0x31   : > { %737 = vmatmul.msk.f32.gmra.mxu3 %vm298_vm0, %v295_v17 }
  0x32   : > { %733 = vmatmul.msk.f32.gmra.mxu2 %vm298_vm0, %v291_v16 }
  0x95   : > { %v364_v20 = vpop.f32.mrf.mxu0  ;;  %v376_v21 = vpop.f32.mrf.mxu1 }
  0x96   : > { %412 = vst [vmem:[%s984_s9] sm:$0xff] %v364_v20  ;;  %v436_v22 = vmul.f32 %v977_v18, %v376_v21  ;;  %v501_v23 = vmul.f32 %v982_v19, %v364_v20  ;;  %v432_v24 = vmul.f32 %v977_v18, %v364_v20  ;;  %v505_v26 = vmul.f32 %v982_v19, %v376_v21 }
  0x97   : > { %416 = vst [vmem:[%s984_s9 + $0x20] sm:$0xff] %v376_v21 }
  0x98   : > { %456 = vadd.xlane.f32.xlu2 %v436_v22  ;;  %517 = vadd.xlane.f32.xlu1 %v501_v23 }
  0x99   : > { %448 = vadd.xlane.f32.xlu0 %v432_v24 }
  0x9c   : > { %v400_v25 = vpop.f32.mrf.mxu3 }
  0x9d   : > { %v388_v27 = vpop.f32.mrf.mxu2  ;;  %424 = vst [vmem:[%s984_s9 + $0x60] sm:$0xff] %v400_v25  ;;  %v513_v28 = vmul.f32 %v982_v19, %v400_v25  ;;  %v444_v29 = vmul.f32 %v977_v18, %v400_v25  ;;  %v367_v30 = vpop.f32.mrf.mxu0 }
  0x9e   : > { %v379_v31 = vpop.f32.mrf.mxu1  ;;  %420 = vst [vmem:[%s984_s9 + $0x40] sm:$0xff] %v388_v27  ;;  %v440_v33 = vmul.f32 %v977_v18, %v388_v27  ;;  %v509_v36 = vmul.f32 %v982_v19, %v388_v27  ;;  %v433_v43 = vmul.f32 %v977_v18, %v367_v30  ;;  %v502_v50 = vmul.f32 %v982_v19, %v367_v30 }
  0x9f   : > { %413 = vst [vmem:[%s984_s9 + $0x8] sm:$0xff] %v367_v30  ;;  %v437_v39 = vmul.f32 %v977_v18, %v379_v31  ;;  %v506_v49 = vmul.f32 %v982_v19, %v379_v31 }
  0xa0   : > { %525 = vadd.xlane.f32.xlu2 %v505_v26  ;;  %541 = vadd.xlane.f32.xlu1 %v513_v28  ;;  %417 = vst [vmem:[%s984_s9 + $0x28] sm:$0xff] %v379_v31 }
  0xa1   : > { %472 = vadd.xlane.f32.xlu0 %v444_v29 }
  0xa4   : > { %v998_v32 = vpop.f32.mrf.mxu3 }
  0xa5   : > { %v391_v34 = vpop.f32.mrf.mxu2  ;;  %425 = vst [vmem:[%s984_s9 + $0x68] sm:$0xff] %v998_v32  ;;  %v445_v35 = vmul.f32 %v977_v18, %v998_v32  ;;  %v370_v37 = vpop.f32.mrf.mxu0  ;;  %v514_v0 = vmul.f32 %v982_v19, %v998_v32 }
  0xa6   : > { %v382_v38 = vpop.f32.mrf.mxu1  ;;  %421 = vst [vmem:[%s984_s9 + $0x48] sm:$0xff] %v391_v34  ;;  %v510_v40 = vmul.f32 %v982_v19, %v391_v34  ;;  %v434_v46 = vmul.f32 %v977_v18, %v370_v37  ;;  %v441_v53 = vmul.f32 %v977_v18, %v391_v34  ;;  %v503_v59 = vmul.f32 %v982_v19, %v370_v37 }
  0xa7   : > { %414 = vst [vmem:[%s984_s9 + $0x10] sm:$0xff] %v370_v37  ;;  %v507_v52 = vmul.f32 %v982_v19, %v382_v38  ;;  %v438_v56 = vmul.f32 %v977_v18, %v382_v38 }
  0xa8   : > { %464 = vadd.xlane.f32.xlu2 %v440_v33  ;;  %474 = vadd.xlane.f32.xlu1 %v445_v35  ;;  %418 = vst [vmem:[%s984_s9 + $0x30] sm:$0xff] %v382_v38 }
  0xa9   : > { %533 = vadd.xlane.f32.xlu0 %v509_v36 }
  0xac   : > { %v1011_v41 = vpop.f32.mrf.mxu3 }
  0xad   : > { %v394_v42 = vpop.f32.mrf.mxu2  ;;  %426 = vst [vmem:[%s984_s9 + $0x70] sm:$0xff] %v1011_v41  ;;  %v373_v44 = vpop.f32.mrf.mxu0  ;;  %v446_v51 = vmul.f32 %v977_v18, %v1011_v41 }
  0xae   : > { %422 = vst [vmem:[%s984_s9 + $0x50] sm:$0xff] %v394_v42  ;;  %v385_v45 = vpop.f32.mrf.mxu1  ;;  %v511_v54 = vmul.f32 %v982_v19, %v394_v42  ;;  %v442_v55 = vmul.f32 %v977_v18, %v394_v42  ;;  %v435_v58 = vmul.f32 %v977_v18, %v373_v44  ;;  %v504_v1 = vmul.f32 %v982_v19, %v373_v44 }
  0xaf   : > { %415 = vst [vmem:[%s984_s9 + $0x18] sm:$0xff] %v373_v44  ;;  %v508_v57 = vmul.f32 %v982_v19, %v385_v45  ;;  %v439_v61 = vmul.f32 %v977_v18, %v385_v45 }
  0xb0   : > { %458 = vadd.xlane.f32.xlu2 %v437_v39  ;;  %535 = vadd.xlane.f32.xlu1 %v510_v40  ;;  %419 = vst [vmem:[%s984_s9 + $0x38] sm:$0xff] %v385_v45 }
  0xb1   : > { %450 = vadd.xlane.f32.xlu0 %v433_v43 }
  0xb4   : > { %v409_v48 = vpop.f32.mrf.mxu3 }
  0xb5   : > { %v397_v47 = vpop.f32.mrf.mxu2  ;;  %427 = vst [vmem:[%s984_s9 + $0x78] sm:$0xff] %v409_v48  ;;  %v447_v62 = vmul.f32 %v977_v18, %v409_v48 }
  0xb6   : > { %423 = vst [vmem:[%s984_s9 + $0x58] sm:$0xff] %v397_v47  ;;  %v443_v60 = vmul.f32 %v977_v18, %v397_v47  ;;  %v512_v63 = vmul.f32 %v982_v19, %v397_v47 }
  0xb8   : > { %519 = vadd.xlane.f32.xlu2 %v502_v50  ;;  %452 = vadd.xlane.f32.xlu1 %v434_v46 }
  0xb9   : > { %527 = vadd.xlane.f32.xlu0 %v506_v49 }
  0xc0   : > { %476 = vadd.xlane.f32.xlu2 %v446_v51  ;;  %529 = vadd.xlane.f32.xlu1 %v507_v52 }
  0xc1   : > { %466 = vadd.xlane.f32.xlu0 %v441_v53 }
  0xc8   : > { %537 = vadd.xlane.f32.xlu2 %v511_v54  ;;  %468 = vadd.xlane.f32.xlu1 %v442_v55 }
  0xc9   : > { %460 = vadd.xlane.f32.xlu0 %v438_v56 }
  0xd0   : > { %531 = vadd.xlane.f32.xlu2 %v508_v57  ;;  %454 = vadd.xlane.f32.xlu1 %v435_v58 }
  0xd1   : > { %521 = vadd.xlane.f32.xlu0 %v503_v59 }
  0xd8   : > { %470 = vadd.xlane.f32.xlu2 %v443_v60  ;;  %462 = vadd.xlane.f32.xlu1 %v439_v61 }
  0xd9   : > { %478 = vadd.xlane.f32.xlu0 %v447_v62 }
  0xda   : > { %820 = shalt.err (!%p817_p3)
}
  0xdb   : > { %s857_s18 = smov 128   ;;  %s858_s10 = smov 8   ;;  %v516_v2 = vmul.f32 %v982_v19, %v409_v48  ;;  %v515_v3 = vmul.f32 %v982_v19, %v1011_v41  ;;  %vm480_vm1 = vcmask 7168  }
  0xdc   : > { %750 = dma.vmem_to_hbm [thread:$0]  (%p932_p5), %s589_s15, 2048, %s591_s16, %s566_s17, %s857_s18, %s857_s18, %s858_s10  }
  0xdd   : > { %s1065_s13 = scalar_lea.vmem %s1160_s6, %s949_s14  ;;  %s1071_s7 = scalar_lea.vmem %s1159_s5, %s949_s14 }
  0xe0   : > { %543 = vadd.xlane.f32.xlu2 %v514_v0  ;;  %523 = vadd.xlane.f32.xlu1 %v504_v1 }
  0xe1   : > { %539 = vadd.xlane.f32.xlu0 %v512_v63 }
  0xe8   : > { %547 = vadd.xlane.f32.xlu1 %v516_v2 }
  0xe9   : > { %545 = vadd.xlane.f32.xlu0 %v515_v3 }
 0x10b   : > { %v457_v4 = vpop.xlane.xlu2 %456  ;;  %v518_v5 = vpop.xlane.xlu1 %517 }
 0x10c   : > { %485 = vst.msk [vmem:[%s1071_s7 + $0x20] sm:$0xff] %vm480_vm1, %v457_v4  ;;  %v449_v6 = vpop.xlane.xlu0 %448 }
 0x10d   : > { %549 = vst.msk [vmem:[%s1065_s13] sm:$0xff] %vm480_vm1, %v518_v5 }
 0x10e   : > { %481 = vst.msk [vmem:[%s1071_s7] sm:$0xff] %vm480_vm1, %v449_v6 }
 0x113   : > { %v526_v7 = vpop.xlane.xlu2 %525  ;;  %v542_v8 = vpop.xlane.xlu1 %541 }
 0x114   : > { %553 = vst.msk [vmem:[%s1065_s13 + $0x20] sm:$0xff] %vm480_vm1, %v526_v7  ;;  %v473_v9 = vpop.xlane.xlu0 %472 }
 0x115   : > { %561 = vst.msk [vmem:[%s1065_s13 + $0x60] sm:$0xff] %vm480_vm1, %v542_v8 }
 0x116   : > { %493 = vst.msk [vmem:[%s1071_s7 + $0x60] sm:$0xff] %vm480_vm1, %v473_v9 }
 0x11b   : > { %v465_v10 = vpop.xlane.xlu2 %464  ;;  %v475_v11 = vpop.xlane.xlu1 %474 }
 0x11c   : > { %489 = vst.msk [vmem:[%s1071_s7 + $0x40] sm:$0xff] %vm480_vm1, %v465_v10  ;;  %v534_v12 = vpop.xlane.xlu0 %533 }
 0x11d   : > { %494 = vst.msk [vmem:[%s1071_s7 + $0x68] sm:$0xff] %vm480_vm1, %v475_v11 }
 0x11e   : > { %557 = vst.msk [vmem:[%s1065_s13 + $0x40] sm:$0xff] %vm480_vm1, %v534_v12 }
 0x123   : > { %v459_v13 = vpop.xlane.xlu2 %458  ;;  %v536_v14 = vpop.xlane.xlu1 %535 }
 0x124   : > { %486 = vst.msk [vmem:[%s1071_s7 + $0x28] sm:$0xff] %vm480_vm1, %v459_v13  ;;  %v451_v15 = vpop.xlane.xlu0 %450 }
 0x125   : > { %558 = vst.msk [vmem:[%s1065_s13 + $0x48] sm:$0xff] %vm480_vm1, %v536_v14 }
 0x126   : > { %482 = vst.msk [vmem:[%s1071_s7 + $0x8] sm:$0xff] %vm480_vm1, %v451_v15 }
 0x12b   : > { %v520_v16 = vpop.xlane.xlu2 %519  ;;  %v453_v17 = vpop.xlane.xlu1 %452 }
 0x12c   : > { %550 = vst.msk [vmem:[%s1065_s13 + $0x8] sm:$0xff] %vm480_vm1, %v520_v16  ;;  %v528_v18 = vpop.xlane.xlu0 %527 }
 0x12d   : > { %554 = vst.msk [vmem:[%s1065_s13 + $0x28] sm:$0xff] %vm480_vm1, %v528_v18 }
 0x12e   : > { %483 = vst.msk [vmem:[%s1071_s7 + $0x10] sm:$0xff] %vm480_vm1, %v453_v17 }
 0x133   : > { %v477_v19 = vpop.xlane.xlu2 %476  ;;  %v530_v20 = vpop.xlane.xlu1 %529 }
 0x134   : > { %495 = vst.msk [vmem:[%s1071_s7 + $0x70] sm:$0xff] %vm480_vm1, %v477_v19  ;;  %v467_v21 = vpop.xlane.xlu0 %466 }
 0x135   : > { %490 = vst.msk [vmem:[%s1071_s7 + $0x48] sm:$0xff] %vm480_vm1, %v467_v21 }
 0x136   : > { %555 = vst.msk [vmem:[%s1065_s13 + $0x30] sm:$0xff] %vm480_vm1, %v530_v20 }
 0x13b   : > { %v538_v22 = vpop.xlane.xlu2 %537  ;;  %v469_v23 = vpop.xlane.xlu1 %468 }
 0x13c   : > { %559 = vst.msk [vmem:[%s1065_s13 + $0x50] sm:$0xff] %vm480_vm1, %v538_v22  ;;  %v461_v24 = vpop.xlane.xlu0 %460 }
 0x13d   : > { %487 = vst.msk [vmem:[%s1071_s7 + $0x30] sm:$0xff] %vm480_vm1, %v461_v24 }
 0x13e   : > { %491 = vst.msk [vmem:[%s1071_s7 + $0x50] sm:$0xff] %vm480_vm1, %v469_v23 }
 0x143   : > { %v532_v25 = vpop.xlane.xlu2 %531  ;;  %v455_v26 = vpop.xlane.xlu1 %454 }
 0x144   : > { %556 = vst.msk [vmem:[%s1065_s13 + $0x38] sm:$0xff] %vm480_vm1, %v532_v25  ;;  %v522_v27 = vpop.xlane.xlu0 %521 }
 0x145   : > { %551 = vst.msk [vmem:[%s1065_s13 + $0x10] sm:$0xff] %vm480_vm1, %v522_v27 }
 0x146   : > { %484 = vst.msk [vmem:[%s1071_s7 + $0x18] sm:$0xff] %vm480_vm1, %v455_v26 }
 0x14b   : > { %v471_v28 = vpop.xlane.xlu2 %470  ;;  %v463_v29 = vpop.xlane.xlu1 %462 }
 0x14c   : > { %492 = vst.msk [vmem:[%s1071_s7 + $0x58] sm:$0xff] %vm480_vm1, %v471_v28  ;;  %v479_v30 = vpop.xlane.xlu0 %478 }
 0x14d   : > { %496 = vst.msk [vmem:[%s1071_s7 + $0x78] sm:$0xff] %vm480_vm1, %v479_v30 }
 0x14e   : > { %488 = vst.msk [vmem:[%s1071_s7 + $0x38] sm:$0xff] %vm480_vm1, %v463_v29 }
 0x153   : > { %v544_v31 = vpop.xlane.xlu2 %543  ;;  %v524_v32 = vpop.xlane.xlu1 %523 }
 0x154   : > { %562 = vst.msk [vmem:[%s1065_s13 + $0x68] sm:$0xff] %vm480_vm1, %v544_v31  ;;  %v540_v33 = vpop.xlane.xlu0 %539 }
 0x155   : > { %560 = vst.msk [vmem:[%s1065_s13 + $0x58] sm:$0xff] %vm480_vm1, %v540_v33 }
 0x156   : > { %552 = vst.msk [vmem:[%s1065_s13 + $0x18] sm:$0xff] %vm480_vm1, %v524_v32 }
 0x15b   : > { %v548_v34 = vpop.xlane.xlu1 %547 }
 0x15c   : > { %v546_v35 = vpop.xlane.xlu0 %545  ;;  %564 = vst.msk [vmem:[%s1065_s13 + $0x78] sm:$0xff] %vm480_vm1, %v548_v34 }
 0x15d   : > { %563 = vst.msk [vmem:[%s1065_s13 + $0x70] sm:$0xff] %vm480_vm1, %v546_v35 }
 0x15e PF: > { %p756_p4 = scmp.ge.s32.totalorder %s855_s24, 2  ;;  %s613_s14 = sand.u32 1, %s843_s21  }
 0x15f   : > { %s614_s15 = scalar_lea.sflag [#allocation3], %s613_s14 }
 0x160   : > { %p753_p5 = pnand %p756_p4, %p936_p6 }
 0x162   : > { %p754_p7 = pneg %p753_p5 }
 0x164   : > { %838 = dma.done.wait (%p754_p7), %s614_s15, 2048  }
 0x165   : > { %840 = vsyncadd (%p754_p7), %s614_s15, 4294965248  ;;  %p17_p8 = scmp.ge.s32.totalorder %s919_s27, 4   ;;  %s1163_s21 = smov %s847_s22 }
 0x166   : > { %s1164_s22 = smov %s851_s23  ;;  %s1165_s23 = smov %s930_s30 }
 0x167   : > { %s1166_s24 = smov %s919_s27  ;;  %19 = sbr.rel (!%p17_p8) target bundleno = 3 (0x3), region = 95 }
 0x16c   :  { %636 = vsyncpa [#allocation3], 1 }
 0x16d   :  { %638 = vsyncpa [#allocation3 + $0x1], 1 }

</bundles_post_ra>
